<compile_context>
chip_gen: v6e
topology: v6e:2x2x1
jax: 0.10.0
libtpu: 0.0.40
codegen_flags: <defaults>
</compile_context>

<pallas_src>
import functools

import numpy as np
import jax
import jax.numpy as jnp
from jax.experimental import pallas as pl
from jax.experimental.pallas import tpu as pltpu

BN_EPS = 1e-5
LANE = 128


def fft_block_kernel(x_ref, basis_ref, interp_ref, w_ref, pboth_ref,
                     gamma_ref, beta_ref, out_ref, *, inv_n):
    Fp = interp_ref.shape[0]            # lane-padded rfft bin count (mult of 128)

    x = x_ref[...]                                                      # (BC, L)

    # Fused real-DFT: one (BC, L) @ (L, 2Fp) dot; cos/sin halves are
    # 128-lane-tile-aligned slices of the result.
    spec = jnp.dot(x, basis_ref[...], preferred_element_type=jnp.float32)
    re = spec[:, :Fp]
    im = spec[:, Fp:]
    # TODO(synk): 'im' has the opposite sign to Im(rfft); fine for magnitude only.
    mag = jnp.sqrt(re * re + im * im)   # |rfft(x)| in lanes [0, F); zeros after

    # Linear interpolation (align_corners=True): (BC, Fp) @ (Fp, L) dot.
    # Rows >= F of interp are zero, matching the zero-padded mag lanes.
    y = jnp.dot(mag, interp_ref[...], preferred_element_type=jnp.float32)

    # 1x1 conv as block-diagonal channel matmul on the batch-stacked slab.
    # (conv bias omitted: cancels against the training-mode BN mean)
    z = jnp.dot(w_ref[...], y, preferred_element_type=jnp.float32)      # (BC, L)

    # BatchNorm1d training statistics per channel over (B, L).
    # Cross-batch channel sum + broadcast done via one matmul against
    # P_both = kron(ones(B,B), eye(C)) -- MXU is idle here, so this replaces
    # sublane shuffles/concats on the serial critical path for free.
    row_s = jnp.sum(z, axis=1, keepdims=True)                           # (BC, 1)
    row_ss = jnp.sum(z * z, axis=1, keepdims=True)                      # (BC, 1)
    mean = jnp.dot(pboth_ref[...], row_s,
                   preferred_element_type=jnp.float32) * inv_n          # (BC, 1)
    msq = jnp.dot(pboth_ref[...], row_ss,
                  preferred_element_type=jnp.float32) * inv_n           # (BC, 1)
    var = jnp.maximum(msq - mean * mean, 0.0)   # clamp: one-pass var can go < 0
    inv_std = jax.lax.rsqrt(var + BN_EPS)

    # gamma/beta arrive pre-tiled to (BC, 1): fold BN affine into one FMA + ReLU.
    scale = gamma_ref[...] * inv_std
    shift = beta_ref[...] - mean * scale
    out_ref[...] = jnp.maximum(z * scale + shift, 0.0)


def _round_up(n, m):
    return ((n + m - 1) // m) * m


@functools.lru_cache(maxsize=None)
def _make_constants(B, C, L):
    """Numpy constants, cached per (B, C, L) so they only run at trace time."""
    F = L // 2 + 1
    Fp = _round_up(F, LANE)             # lane-align the sin block

    # Fused real-DFT basis: cos in columns [0, F), sin in [Fp, Fp+F).
    n = np.arange(L)[:, None].astype(np.float64)
    k = np.arange(F)[None, :].astype(np.float64)
    ang = 2.0 * np.pi * n * k / L
    basis = np.zeros((L, 2 * Fp), np.float32)
    basis[:, :F] = np.cos(ang)
    basis[:, Fp:Fp + F] = np.sin(ang)

    # Linear interpolation (align_corners=True), rows padded to Fp with zeros.
    interp = np.zeros((Fp, L), np.float32)
    for j in range(L):
        src = 0.0 if L == 1 else j * (F - 1) / (L - 1)
        i0 = min(int(np.floor(src)), F - 1)
        i1 = min(i0 + 1, F - 1)
        w1 = src - i0
        interp[i0, j] += 1.0 - w1
        interp[i1, j] += w1

    # Per-channel sum-then-broadcast across the B batch blocks, as one matrix.
    p_both = np.kron(np.ones((B, B), np.float32), np.eye(C, dtype=np.float32))
    return basis, interp, p_both


@jax.jit
def fft_block(x, conv_w, conv_b, gamma, beta):
    B, C, L = x.shape
    basis, interp, p_both = _make_constants(B, C, L)   # trace-time numpy

    # Block-diagonal 1x1-conv weight so the conv is one dot on the (B*C, L) slab.
    w2d = conv_w.reshape(C, C).astype(jnp.float32)
    w_big = jnp.kron(jnp.eye(B, dtype=jnp.float32), w2d)          # (BC, BC)

    # conv_b not passed: a per-channel constant before training-mode BN cancels
    # exactly in (z - mean).  (Would NOT hold for eval-mode running stats.)
    del conv_b

    gamma_bc = jnp.tile(gamma.astype(jnp.float32).reshape(C, 1), (B, 1))
    beta_bc = jnp.tile(beta.astype(jnp.float32).reshape(C, 1), (B, 1))

    kernel = functools.partial(fft_block_kernel, inv_n=1.0 / float(B * L))
    vmem = pl.BlockSpec(memory_space=pltpu.MemorySpace.VMEM)
    out = pl.pallas_call(
        kernel,
        out_shape=jax.ShapeDtypeStruct((B * C, L), jnp.float32),
        in_specs=[vmem] * 7,
        out_specs=vmem,
        input_output_aliases={0: 0},     # x and out: same shape/dtype, reuse HBM
    )(
        x.reshape(B * C, L).astype(jnp.float32),   # batch-stacked, sublane-dense
        jnp.asarray(basis),
        jnp.asarray(interp),
        w_big,
        jnp.asarray(p_both),
        gamma_bc,
        beta_bc,
    )
    return out.reshape(B, C, L)


def reference(x, conv_w, conv_b, gamma, beta):
    B, C, L = x.shape
    F = L // 2 + 1
    _, interp, _ = _make_constants(B, C, L)
    fft_mag = jnp.abs(jnp.fft.rfft(x, axis=2))
    y = jnp.einsum('bcf,fl->bcl', fft_mag, jnp.asarray(interp[:F]))
    z = jnp.einsum('oc,bcl->bol', conv_w.reshape(C, C), y) + conv_b[None, :, None]
    mean = z.mean(axis=(0, 2), keepdims=True)
    var = ((z - mean) ** 2).mean(axis=(0, 2), keepdims=True)
    zn = (z - mean) / jnp.sqrt(var + BN_EPS)
    return jnp.maximum(gamma[None, :, None] * zn + beta[None, :, None], 0.0)


if __name__ == "__main__":
    B, C, L = 2, 4, 16
    key = jax.random.PRNGKey(0)
    kx, kw, kb = jax.random.split(key, 3)

    x = jax.random.normal(kx, (B, C, L), dtype=jnp.float32)
    # Conv1d(in_channels=C, out_channels=C, kernel_size=1) parameters.
    conv_w = jax.random.normal(kw, (C, C, 1), dtype=jnp.float32) * 0.3
    conv_b = jax.random.normal(kb, (C,), dtype=jnp.float32) * 0.1
    # BatchNorm1d default init: weight=1, bias=0.
    gamma = jnp.ones((C,), dtype=jnp.float32)
    beta = jnp.zeros((C,), dtype=jnp.float32)

    out = fft_block(x, conv_w, conv_b, gamma, beta)
    out = jax.block_until_ready(out)

    ref = reference(x, conv_w, conv_b, gamma, beta)
    np.testing.assert_allclose(np.asarray(out), np.asarray(ref), rtol=2e-3, atol=2e-3)

    print("KERNEL_OK")
</pallas_src>

<mosaic_0001>
module attributes {stable_mosaic.version = 11 : i64} {
  func.func @fft_block_kernel(%arg0: memref<8x16xf32, #tpu.memory_space<vmem>>, %arg1: memref<16x256xf32, #tpu.memory_space<vmem>>, %arg2: memref<128x16xf32, #tpu.memory_space<vmem>>, %arg3: memref<8x8xf32, #tpu.memory_space<vmem>>, %arg4: memref<8x8xf32, #tpu.memory_space<vmem>>, %arg5: memref<8x1xf32, #tpu.memory_space<vmem>>, %arg6: memref<8x1xf32, #tpu.memory_space<vmem>>, %arg7: memref<8x16xf32, #tpu.memory_space<vmem>>) attributes {dimension_semantics = [], scalar_prefetch = 0 : i64, scratch_operands = 0 : i64, tpu.core_type = #tpu.core_type<tc>} {
    %c0 = arith.constant 0 : index
    %c0_0 = arith.constant 0 : index
    %0 = vector.load %arg0[%c0, %c0_0] : memref<8x16xf32, #tpu.memory_space<vmem>>, vector<8x16xf32>
    %c0_1 = arith.constant 0 : index
    %c0_2 = arith.constant 0 : index
    %1 = vector.load %arg1[%c0_1, %c0_2] : memref<16x256xf32, #tpu.memory_space<vmem>>, vector<16x256xf32>
    %cst = arith.constant dense<0.000000e+00> : vector<8x256xf32>
    %2 = tpu.matmul %0, %1, %cst {dimension_numbers = #tpu.dot_dimension_numbers<[1], [0], [0], [1], [0, 0, 1, 1], [], []>} : vector<8x16xf32>, vector<16x256xf32>, vector<8x256xf32> -> vector<8x256xf32>
    %3 = vector.extract_strided_slice %2 {offsets = [0, 0], sizes = [8, 128], strides = [1, 1]} : vector<8x256xf32> to vector<8x128xf32>
    %4 = vector.extract_strided_slice %2 {offsets = [0, 128], sizes = [8, 128], strides = [1, 1]} : vector<8x256xf32> to vector<8x128xf32>
    %5 = arith.mulf %3, %3 : vector<8x128xf32>
    %6 = arith.mulf %4, %4 : vector<8x128xf32>
    %7 = arith.addf %5, %6 : vector<8x128xf32>
    %8 = math.sqrt %7 : vector<8x128xf32>
    %c0_3 = arith.constant 0 : index
    %c0_4 = arith.constant 0 : index
    %9 = vector.load %arg2[%c0_3, %c0_4] : memref<128x16xf32, #tpu.memory_space<vmem>>, vector<128x16xf32>
    %cst_5 = arith.constant dense<0.000000e+00> : vector<8x16xf32>
    %10 = tpu.matmul %8, %9, %cst_5 {dimension_numbers = #tpu.dot_dimension_numbers<[1], [0], [0], [1], [0, 0, 1, 1], [], []>} : vector<8x128xf32>, vector<128x16xf32>, vector<8x16xf32> -> vector<8x16xf32>
    %c0_6 = arith.constant 0 : index
    %c0_7 = arith.constant 0 : index
    %11 = vector.load %arg3[%c0_6, %c0_7] : memref<8x8xf32, #tpu.memory_space<vmem>>, vector<8x8xf32>
    %cst_8 = arith.constant dense<0.000000e+00> : vector<8x16xf32>
    %12 = tpu.matmul %11, %10, %cst_8 {dimension_numbers = #tpu.dot_dimension_numbers<[1], [0], [0], [1], [0, 0, 1, 1], [], []>} : vector<8x8xf32>, vector<8x16xf32>, vector<8x16xf32> -> vector<8x16xf32>
    %cst_9 = arith.constant dense<0.000000e+00> : vector<8xf32>
    %13 = vector.multi_reduction <add>, %12, %cst_9 [1] : vector<8x16xf32> to vector<8xf32>
    %14 = vector.shape_cast %13 : vector<8xf32> to vector<8x1xf32>
    %15 = arith.mulf %12, %12 : vector<8x16xf32>
    %cst_10 = arith.constant dense<0.000000e+00> : vector<8xf32>
    %16 = vector.multi_reduction <add>, %15, %cst_10 [1] : vector<8x16xf32> to vector<8xf32>
    %17 = vector.shape_cast %16 : vector<8xf32> to vector<8x1xf32>
    %c0_11 = arith.constant 0 : index
    %c0_12 = arith.constant 0 : index
    %18 = vector.load %arg4[%c0_11, %c0_12] : memref<8x8xf32, #tpu.memory_space<vmem>>, vector<8x8xf32>
    %cst_13 = arith.constant dense<0.000000e+00> : vector<8x1xf32>
    %19 = tpu.matmul %18, %14, %cst_13 {dimension_numbers = #tpu.dot_dimension_numbers<[1], [0], [0], [1], [0, 0, 1, 1], [], []>} : vector<8x8xf32>, vector<8x1xf32>, vector<8x1xf32> -> vector<8x1xf32>
    %cst_14 = arith.constant 3.125000e-02 : f32
    %20 = vector.broadcast %cst_14 : f32 to vector<8x1xf32>
    %21 = arith.mulf %19, %20 : vector<8x1xf32>
    %c0_15 = arith.constant 0 : index
    %c0_16 = arith.constant 0 : index
    %22 = vector.load %arg4[%c0_15, %c0_16] : memref<8x8xf32, #tpu.memory_space<vmem>>, vector<8x8xf32>
    %cst_17 = arith.constant dense<0.000000e+00> : vector<8x1xf32>
    %23 = tpu.matmul %22, %17, %cst_17 {dimension_numbers = #tpu.dot_dimension_numbers<[1], [0], [0], [1], [0, 0, 1, 1], [], []>} : vector<8x8xf32>, vector<8x1xf32>, vector<8x1xf32> -> vector<8x1xf32>
    %cst_18 = arith.constant 3.125000e-02 : f32
    %24 = vector.broadcast %cst_18 : f32 to vector<8x1xf32>
    %25 = arith.mulf %23, %24 : vector<8x1xf32>
    %26 = arith.mulf %21, %21 : vector<8x1xf32>
    %27 = arith.subf %25, %26 : vector<8x1xf32>
    %cst_19 = arith.constant 0.000000e+00 : f32
    %28 = vector.broadcast %cst_19 : f32 to vector<8x1xf32>
    %29 = arith.maximumf %27, %28 : vector<8x1xf32>
    %cst_20 = arith.constant 9.99999974E-6 : f32
    %30 = vector.broadcast %cst_20 : f32 to vector<8x1xf32>
    %31 = arith.addf %29, %30 : vector<8x1xf32>
    %32 = math.rsqrt %31 : vector<8x1xf32>
    %c0_21 = arith.constant 0 : index
    %c0_22 = arith.constant 0 : index
    %33 = vector.load %arg5[%c0_21, %c0_22] : memref<8x1xf32, #tpu.memory_space<vmem>>, vector<8x1xf32>
    %34 = arith.mulf %33, %32 : vector<8x1xf32>
    %c0_23 = arith.constant 0 : index
    %c0_24 = arith.constant 0 : index
    %35 = vector.load %arg6[%c0_23, %c0_24] : memref<8x1xf32, #tpu.memory_space<vmem>>, vector<8x1xf32>
    %36 = arith.mulf %21, %34 : vector<8x1xf32>
    %37 = arith.subf %35, %36 : vector<8x1xf32>
    %38 = vector.broadcast %34 : vector<8x1xf32> to vector<8x16xf32>
    %39 = arith.mulf %12, %38 : vector<8x16xf32>
    %40 = vector.broadcast %37 : vector<8x1xf32> to vector<8x16xf32>
    %41 = arith.addf %39, %40 : vector<8x16xf32>
    %cst_25 = arith.constant 0.000000e+00 : f32
    %42 = vector.broadcast %cst_25 : f32 to vector<8x16xf32>
    %43 = arith.maximumf %41, %42 : vector<8x16xf32>
    %c0_26 = arith.constant 0 : index
    %c0_27 = arith.constant 0 : index
    %44 = vector.load %arg7[%c0_26, %c0_27] : memref<8x16xf32, #tpu.memory_space<vmem>>, vector<8x16xf32>
    tpu.vector_store %arg7[%c0_26, %c0_27], %43 {strides = array<i32>} : memref<8x16xf32, #tpu.memory_space<vmem>>, vector<8x16xf32>,
    return
  }
}

</mosaic_0001>

<bundles_post_ra>
// kernel: fft_block.1
= control target key start
LH: loop header
LB: loop body
LE: loop exit
PB: predicated region body
PF: predicated region fallthrough
CT: control target
= control target key end

     0   :  { %12 = vsyncpa [#allocation3], 0  ;;  %s584_s24 = smov [#allocation2]   ;;  %s698_s0 = inlined_call_operand.vmem [shape: f32[8,16], index: 0, kind: input, shape index: {}, may-alias: {0,7}]   ;;  %s699_s1 = inlined_call_operand.vmem [shape: f32[16,256], index: 1, kind: input, shape index: {}]   ;;  %s700_s2 = inlined_call_operand.hbm [shape: f32[128,16], index: 2, kind: input, shape index: {}]   ;;  %s701_s3 = inlined_call_operand.vmem [shape: f32[8,8], index: 3, kind: input, shape index: {}]   ;;  %s702_s4 = inlined_call_operand.vmem [shape: f32[8,8], index: 4, kind: input, shape index: {}]   ;;  %s703_s5 = inlined_call_operand.vmem [shape: f32[8,1], index: 5, kind: input, shape index: {}]   ;;  %s704_s6 = inlined_call_operand.vmem [shape: f32[8,1], index: 6, kind: input, shape index: {}]   ;;  %s705_s7 = inlined_call_operand.vmem [shape: f32[8,16], index: 7, kind: output, shape index: {}, may-alias: {0,7}]  }
   0x1   :  { %s22_s25 = sshll.u32 %s584_s24, 4  ;;  %s23_s25 = int_to_ptr.vmem [resolvable:$true] %s22_s25 }
   0x2   :  { %s570_s26 = scalar_lea.vmem %s23_s25, 2048  ;;  %p575_p1 = scmp.lt.s32.totalorder %s23_s25, %s23_s25 }
   0x3   :  { %p571_p0 = scmp.ne.s32.totalorder %s23_s25, %s570_s26  ;;  %p576_p2 = scmp.lt.s32.totalorder %s570_s26, %s570_s26 }
   0x5   :  { %p577_p3 = por %p576_p2, %p575_p1 }
   0x7   :  { %p578_p4 = pnand %p577_p3, %p571_p0 }
   0x9   :  { %581 = shalt.err (!%p578_p4)
}
   0xa   :  { %s585_s27 = smov 128   ;;  %s586_s28 = smov 8  }
   0xb   :  { %28 = dma.hbm_to_vmem [thread:$0]  %s700_s2, 2048, %s23_s25, [#allocation3], %s585_s27, %s585_s27, %s586_s28  }
   0xc   :  { %582 = dma.done.wait [#allocation3], 2048  }
   0xd   :  { %583 = vsyncadd [#allocation3], 4294965248  ;;  %v587_v0 = vmov 0.0   ;;  %v44_v1 = vld [vmem:[%s699_s1 + $0x18] sm:$0xff]  ;;  %v43_v2 = vld [vmem:[%s699_s1 + $0x10] sm:$0xff]  ;;  %vm45_vm0 = vcmask 130048  }
   0xe   :  { %113 = vmatprep.mubr.f32.mxu0 %v587_v0  ;;  %500 = vmatprep.subr.mxu1 %v587_v0  ;;  %v42_v3 = vld [vmem:[%s699_s1 + $0x8] sm:$0xff]  ;;  %v41_v4 = vld [vmem:[%s699_s1] sm:$0xff]  ;;  %v145_v5 = vld [vmem:[#allocation2 + $0x78] sm:$0xff]  ;;  %vm588_vm1 = vmmov 0   ;;  %vm217_vm4 = vcmask 64512   ;;  %v589_v43 = vmov 0  }
   0xf   :  { %77 = vmatprep.subr.mxu0 %v44_v1  ;;  %v40_v6 = vld [vmem:[%s698_s0] sm:$0xff]  ;;  %501 = vmatpush3.msra.mxu1 %v145_v5  ;;  %v144_v7 = vld [vmem:[#allocation2 + $0x70] sm:$0xff]  ;;  %v143_v8 = vld [vmem:[#allocation2 + $0x68] sm:$0xff] }
  0x10   :  { %78 = vmatpush1.msra.mxu0 %v43_v2  ;;  %502 = vmatprep.subr.mxu1 %v587_v0  ;;  %v142_v9 = vld [vmem:[#allocation2 + $0x60] sm:$0xff]  ;;  %v141_v10 = vld [vmem:[#allocation2 + $0x58] sm:$0xff]  ;;  %v140_v11 = vld [vmem:[#allocation2 + $0x50] sm:$0xff] }
  0x11   :  { %79 = vmatprep.subr.mxu0 %v42_v3  ;;  %503 = vmatpush3.msra.mxu1 %v144_v7  ;;  %v139_v12 = vld [vmem:[#allocation2 + $0x48] sm:$0xff]  ;;  %v138_v13 = vld [vmem:[#allocation2 + $0x40] sm:$0xff]  ;;  %v137_v14 = vld [vmem:[#allocation2 + $0x38] sm:$0xff] }
  0x12   :  { %80 = vmatpush1.msra.mxu0 %v41_v4  ;;  %504 = vmatprep.subr.mxu1 %v587_v0  ;;  %v136_v15 = vld [vmem:[#allocation2 + $0x30] sm:$0xff]  ;;  %v135_v16 = vld [vmem:[#allocation2 + $0x28] sm:$0xff]  ;;  %v134_v17 = vld [vmem:[#allocation2 + $0x20] sm:$0xff] }
  0x13   :  { %473 = vmatmul.mubr.msk.f32.vlgmr.msra.gmra.mxu0 %vm45_vm0, %v40_v6  ;;  %505 = vmatpush3.msra.mxu1 %v143_v8  ;;  %v133_v18 = vld [vmem:[#allocation2 + $0x18] sm:$0xff]  ;;  %v132_v19 = vld [vmem:[#allocation2 + $0x10] sm:$0xff]  ;;  %v131_v20 = vld [vmem:[#allocation2 + $0x8] sm:$0xff] }
  0x14   :  { %535 = vmatprep.subr.mxu0 %v587_v0  ;;  %506 = vmatprep.subr.mxu1 %v587_v0  ;;  %v130_v21 = vld [vmem:[#allocation2] sm:$0xff] }
  0x15   :  { %507 = vmatpush3.msra.mxu1 %v142_v9  ;;  %532 = vmatprep.mubr.msk.f32.mxu1 %vm588_vm1, %v587_v0  ;;  %v216_v32 = vld [vmem:[%s701_s3] sm:$0xff] }
  0x16   :  { %508 = vmatprep.subr.mxu1 %v587_v0  ;;  %537 = vmatprep.mubr.msk.f32.mxu0 %vm588_vm1, %v587_v0  ;;  %v298_v40 = vld [vmem:[%s702_s4] sm:$0xff] }
  0x17   :  { %509 = vmatpush3.msra.mxu1 %v141_v10  ;;  %556 = vset.pattern.permute.xlu1 %v589_v43  ;;  %v449_v54 = vld [vmem:[%s703_s5] sm:$0xff] }
  0x18   :  { %510 = vmatprep.subr.mxu1 %v587_v0  ;;  %557 = vset.pattern.permute.xlu0 %v589_v43  ;;  %v451_v57 = vld [vmem:[%s704_s6] sm:$0xff] }
  0x19   :  { %511 = vmatpush3.msra.mxu1 %v140_v11 }
  0x1a   :  { %512 = vmatprep.subr.mxu1 %v587_v0 }
  0x1b   :  { %513 = vmatpush3.msra.mxu1 %v139_v12 }
  0x1c   :  { %514 = vmatprep.subr.mxu1 %v587_v0 }
  0x1d   :  { %515 = vmatpush3.msra.mxu1 %v138_v13 }
  0x1e   :  { %516 = vmatprep.subr.mxu1 %v587_v0 }
  0x1f   :  { %517 = vmatpush3.msra.mxu1 %v137_v14 }
  0x20   :  { %518 = vmatprep.subr.mxu1 %v587_v0 }
  0x21   :  { %519 = vmatpush3.msra.mxu1 %v136_v15 }
  0x22   :  { %520 = vmatprep.subr.mxu1 %v587_v0 }
  0x23   :  { %521 = vmatpush3.msra.mxu1 %v135_v16 }
  0x24   :  { %522 = vmatprep.subr.mxu1 %v587_v0 }
  0x25   :  { %523 = vmatpush3.msra.mxu1 %v134_v17 }
  0x26   :  { %524 = vmatprep.subr.mxu1 %v587_v0 }
  0x27   :  { %525 = vmatpush3.msra.mxu1 %v133_v18 }
  0x28   :  { %526 = vmatprep.subr.mxu1 %v587_v0 }
  0x29   :  { %527 = vmatpush3.msra.mxu1 %v132_v19 }
  0x2a   :  { %528 = vmatprep.subr.mxu1 %v587_v0 }
  0x2b   :  { %529 = vmatpush3.msra.mxu1 %v131_v20 }
  0x2c   :  { %530 = vmatprep.subr.mxu1 %v587_v0 }
  0x2d   :  { %531 = vmatpush3.msra.mxu1 %v130_v21 }
  0xd3   :  { %v115_v22 = vpop.f32.mrf.mxu0 }
  0xd4   :  { %v120_v24 = vmul.f32 %v115_v22, %v115_v22 }
  0xd5   :  { %v117_v23 = vpop.f32.mrf.mxu0 }
  0xd6   :  { %v121_v25 = vmul.f32 %v117_v23, %v117_v23 }
  0xd8   :  { %v122_v26 = vadd.f32 %v121_v25, %v120_v24 }
  0xda   :  { %558 = vrsqrt.f32 %v122_v26  ;;  %vm125_vm2 = vcmp.eq.f32.partialorder %v122_v26, inf  ;;  %v128_v29 = vand.u32 2147483648, %v122_v26  ;;  %vm127_vm3 = vcmp.eq.f32.partialorder %v122_v26, 0.0 }
  0xe7   :  { %v559_v27 = vpop.eup %558 }
  0xe8   :  { %v124_v28 = vmul.f32 %v559_v27, %v122_v26 }
  0xea   :  { %v126_v30 = vsel %vm125_vm2, %v122_v26, %v124_v28 }
  0xeb   :  { %v129_v31 = vsel %vm127_vm3, %v128_v29, %v126_v30 }
  0xec   :  { %533 = vmatmul.mubr.f32.vlgmr.msra.gmra.mxu1 %v129_v31 }
 0x1ac   :  { %v212_v33 = vpop.f32.mrf.mxu1 }
 0x1ad   :  { %536 = vmatpush3.msra.mxu0 %v212_v33 }
 0x1ae   :  { %v534_v34 = vpop.f32.mrf.mxu1  ;;  %538 = vmatmul.mubr.msk.f32.vlgmr.msra.gmra.mxu0 %vm217_vm4, %v216_v32  ;;  %540 = vmatprep.subr.mxu0 %v587_v0 }
 0x1af   :  { %542 = vmatprep.mubr.msk.f32.mxu0 %vm588_vm1, %v587_v0 }
 0x26e   :  { %v287_v35 = vpop.f32.mrf.mxu0 }
 0x26f   :  { %v291_v36 = vsel %vm45_vm0, %v287_v35, 0.0  ;;  %v294_v37 = vmul.f32 %v287_v35, %v287_v35 }
 0x270   :  { %292 = vadd.xlane.f32.xlu0 %v291_v36  ;;  %v539_v38 = vpop.f32.mrf.mxu0 }
 0x271   :  { %v295_v39 = vsel %vm45_vm0, %v294_v37, 0.0 }
 0x274   :  { %296 = vadd.xlane.f32.xlu0 %v295_v39 }
 0x2f9   :  { %v293_v41 = vpop.xlane.xlu0 %292 }
 0x2fa   :  { %541 = vmatpush3.msra.mxu0 %v293_v41 }
 0x2fb   :  { %543 = vmatmul.mubr.msk.f32.vlgmr.msra.gmra.mxu0 %vm217_vm4, %v298_v40  ;;  %545 = vmatprep.subr.mxu0 %v587_v0 }
 0x2fc   :  { %547 = vmatprep.mubr.msk.f32.mxu0 %vm588_vm1, %v587_v0 }
 0x2fd   :  { %v297_v42 = vpop.xlane.xlu0 %296 }
 0x2fe   :  { %546 = vmatpush3.msra.mxu0 %v297_v42 }
 0x2ff   :  { %548 = vmatmul.mubr.msk.f32.vlgmr.msra.gmra.mxu0 %vm217_vm4, %v298_v40 }
 0x3bb   :  { %v368_v44 = vpop.f32.mrf.mxu0 }
 0x3bc   :  { %v372_v45 = vmul.f32 0.03125, %v368_v44 }
 0x3bd   :  { %v544_v46 = vpop.f32.mrf.mxu0 }
 0x3be   :  { %v444_v48 = vmul.f32 %v372_v45, %v372_v45 }
 0x3bf   :  { %v439_v47 = vpop.f32.mrf.mxu0 }
 0x3c0   :  { %v443_v49 = vmul.f32 0.03125, %v439_v47 }
 0x3c1   :  { %v549_v50 = vpop.f32.mrf.mxu0 }
 0x3c2   :  { %v445_v51 = vsub.f32 %v443_v49, %v444_v48 }
 0x3c4   :  { %v446_v52 = vmax.f32 %v445_v51, 0.0 }
 0x3c6   :  { %v447_v53 = vadd.f32 1e-05, %v446_v52 }
 0x3c8   :  { %560 = vrsqrt.f32 %v447_v53 }
 0x3d5   :  { %v561_v55 = vpop.eup %560 }
 0x3d6   :  { %v450_v56 = vmul.f32 %v561_v55, %v449_v54 }
 0x3d8   :  { %456 = vperm.xlu1 %556, %v450_v56   ;;  %v452_v58 = vmul.f32 %v450_v56, %v372_v45 }
 0x3da   :  { %v453_v59 = vsub.f32 %v451_v57, %v452_v58 }
 0x3dc   :  { %462 = vperm.xlu1 %556, %v453_v59  }
 0x453   :  { %v457_v60 = vpop.permute.xlu1 %456 }
 0x454   :  { %v459_v61 = vmul.f32 %v457_v60, %v287_v35 }
 0x457   :  { %v463_v62 = vpop.permute.xlu1 %462 }
 0x458   :  { %v465_v63 = vadd.f32 %v463_v62, %v459_v61 }
 0x45a   :  { %v466_v0 = vmax.f32 %v465_v63, 0.0 }
 0x45c   :  { %467 = vst.msk [vmem:[%s705_s7] sm:$0xff] %vm45_vm0, %v466_v0 }
 0x45d   :  { %472 = vsyncpa [#allocation3], 1 }

</bundles_post_ra>
